<compile_context>
chip_gen: v5e
topology: v5e:2x2
jax: 0.10.0
libtpu: 0.0.40
codegen_flags: <defaults>
</compile_context>

<pallas_src>
import math

import jax
import jax.numpy as jnp
from jax import lax
from jax.experimental import pallas as pl
from jax.experimental.pallas import tpu as pltpu


_ACC_ROWS = 32   # f32 accumulator chunk (sublane rows) kept live at a time
_MIN_GRID = 8    # keep at least this many grid steps (v7x 2-TC load balance)


def _round_up(x, m):
    return ((x + m - 1) // m) * m


def _is_v5_device():
    try:
        return "v5" in jax.devices()[0].device_kind.lower()
    except Exception:
        return False


def _make_kernel(W, TK, TQ, chunk_rows, mode):
    """mode: 'plain' (compute in input dtype), 'bf16_pair' (v6e/v7x),
    'bf16_f32' (v5e: upcast operands at load, arithmetic in f32)."""
    scale = 1.0 / math.sqrt(W)
    num_chunks = TK // chunk_rows

    def kernel(q_ref, k_ref, o_ref):
        # q_ref : [W,  TQ]  (head width in sublanes, q-token lane-dense)
        # k_ref : [TK, W ]  (k-token in sublanes, head width in lanes)
        # o_ref : [TK, TQ]

        def do_chunk(ck):
            # ck: row offset into the [TK, TQ] output tile (multiple of chunk_rows)
            acc = jnp.zeros((chunk_rows, TQ), jnp.float32)
            if mode == "bf16_pair":
                # Packed-bf16 sub/abs + 2-term partial sum: half the VALU slots
                # of f32, one f32 convert+add per pair of w.
                for w0 in range(0, W, 2):
                    q_a = q_ref[w0:w0 + 1, :]                        # [1, TQ]
                    k_a = k_ref[pl.ds(ck, chunk_rows), w0:w0 + 1]    # [rows, 1]
                    part = jnp.abs(q_a - k_a)                        # bf16 [rows, TQ]
                    if w0 + 1 < W:
                        q_b = q_ref[w0 + 1:w0 + 2, :]
                        k_b = k_ref[pl.ds(ck, chunk_rows), w0 + 1:w0 + 2]
                        part = part + jnp.abs(q_b - k_b)             # bf16 pair sum
                    acc = acc + part.astype(jnp.float32)
            elif mode == "bf16_f32":
                # v5e has no bf16 VALU: upcast the small operands at load time so
                # the [rows, TQ] |diff| never needs a per-w f32 convert.
                for w in range(W):
                    q_row = q_ref[w:w + 1, :].astype(jnp.float32)
                    k_col = k_ref[pl.ds(ck, chunk_rows), w:w + 1].astype(jnp.float32)
                    acc = acc + jnp.abs(q_row - k_col)
            else:  # 'plain': sub/abs in the input dtype, f32 accumulate
                for w in range(W):
                    q_row = q_ref[w:w + 1, :]                        # [1, TQ]
                    k_col = k_ref[pl.ds(ck, chunk_rows), w:w + 1]    # [rows, 1]
                    d = jnp.abs(q_row - k_col)
                    acc = acc + d.astype(jnp.float32)
            o_ref[pl.ds(ck, chunk_rows), :] = (-scale * acc).astype(o_ref.dtype)

        if num_chunks == 1:
            do_chunk(0)
        else:
            # A fori_loop (not a static Python loop) bounds the live range of the
            # per-chunk accumulator / temporaries -> no vreg spills at TQ=512.
            def body(c, carry):
                do_chunk(pl.multiple_of(c * chunk_rows, chunk_rows))
                return carry

            lax.fori_loop(0, num_chunks, body, 0, unroll=False)

    return kernel


def _choose_tiles(B, T, H):
    """Largest tiles whose grid still has >= _MIN_GRID steps; else largest tiles."""
    fallback = None
    for cap in (512, 256, 128):
        TQ = min(cap, _round_up(T, 128))
        if T <= _ACC_ROWS:
            TK = _round_up(T, 8)
        else:
            TK = min(cap, _round_up(T, _ACC_ROWS))
        tq_pad = _round_up(T, TQ)
        tk_pad = _round_up(T, TK)
        n_q = tq_pad // TQ
        n_k = tk_pad // TK
        cur = (TQ, TK, tq_pad, tk_pad, n_q, n_k)
        if fallback is None:
            fallback = cur
        if B * H * n_k * n_q >= _MIN_GRID:
            return cur
    return fallback


def l1attn(q, k, *, native_layout=False, out_dtype=None):
    """L1 attention forward.

    q, k: [B, T, H, W].
    Returns [B, Tk, Tq, H] (PyTorch l1attn_cpp convention) by default, or the
    kernel-native [B, H, Tk, Tq] when native_layout=True (saves one full HBM
    round trip of the B*H*T^2 output — prefer it if the consumer can adapt).
    out_dtype (e.g. jnp.bfloat16) narrows only the final store; the
    accumulation is always f32.
    """
    B, T, H, W = q.shape
    assert k.shape == (B, T, H, W)
    out_dtype = q.dtype if out_dtype is None else out_dtype

    TQ, TK, tq_pad, tk_pad, n_q, n_k = _choose_tiles(B, T, H)
    chunk_rows = min(_ACC_ROWS, TK)

    if q.dtype == jnp.bfloat16:
        mode = "bf16_f32" if _is_v5_device() else "bf16_pair"
    else:
        mode = "plain"

    # q -> [B, H, W, Tq_pad] (q-token lane-dense), k -> [B, H, Tk_pad, W].
    # TODO(synk): these input transposes are an extra [B,T,H,W] HBM round trip;
    # fold into the producer if T is small relative to H*W.
    q_t = jnp.transpose(q, (0, 2, 3, 1))
    if tq_pad != T:
        q_t = jnp.pad(q_t, ((0, 0), (0, 0), (0, 0), (0, tq_pad - T)))
    k_t = jnp.transpose(k, (0, 2, 1, 3))
    if tk_pad != T:
        k_t = jnp.pad(k_t, ((0, 0), (0, 0), (0, tk_pad - T), (0, 0)))

    kernel = _make_kernel(W, TK, TQ, chunk_rows, mode)

    out = pl.pallas_call(
        kernel,
        out_shape=jax.ShapeDtypeStruct((B, H, tk_pad, tq_pad), out_dtype),
        grid_spec=pltpu.PrefetchScalarGridSpec(
            num_scalar_prefetch=0,
            grid=(B, H, n_k, n_q),
            in_specs=[
                # q tile (W, TQ): depends only on the innermost q-tile index j.
                pl.BlockSpec((None, None, W, TQ), lambda b, h, i, j: (b, h, 0, j)),
                # k tile (TK, W): invariant over j -> stays resident across q tiles.
                pl.BlockSpec((None, None, TK, W), lambda b, h, i, j: (b, h, i, 0)),
            ],
            out_specs=pl.BlockSpec(
                (None, None, TK, TQ), lambda b, h, i, j: (b, h, i, j)
            ),
        ),
        compiler_params=pltpu.CompilerParams(
            # No reduction axis in the grid -> everything parallel.
            dimension_semantics=("parallel", "parallel", "parallel", "parallel"),
            # Tiles are ~1-2 MiB total (double-buffered); well under all limits.
            vmem_limit_bytes=32 * 1024 * 1024,
        ),
    )(q_t, k_t)

    out = out[:, :, :T, :T]  # drop token padding
    if native_layout:
        return out           # [B, H, Tk, Tq]
    # PyTorch cpp-extension convention [B, Tk, Tq, H]. This transpose is an
    # extra HBM round trip of the largest array; pass native_layout=True to
    # avoid it when the consumer can take [B, H, Tk, Tq].
    return jnp.transpose(out, (0, 2, 3, 1))


def _l1attn_reference(q, k):
    """Pure-JAX reference mirroring the torch/cpp implementation (f32 math)."""
    W = q.shape[-1]
    scale = 1.0 / math.sqrt(W)
    qf = q.astype(jnp.float32)
    kf = k.astype(jnp.float32)
    qq = qf[:, None, :, :, :]   # [B, 1, Tq, H, W]
    kk = kf[:, :, None, :, :]   # [B, Tk, 1, H, W]
    return -scale * jnp.sum(jnp.abs(qq - kk), axis=-1)  # [B, Tk, Tq, H]


if __name__ == "__main__":
    key = jax.random.PRNGKey(0)
    k1, k2, k3, k4 = jax.random.split(key, 4)

    # 1) Small f32 case (single tile, single accumulator chunk), module layout.
    B, T, H, W = 2, 8, 4, 32
    q = jax.random.normal(k1, (B, T, H, W), dtype=jnp.float32)
    k = jax.random.normal(k2, (B, T, H, W), dtype=jnp.float32)
    attn = jax.block_until_ready(l1attn(q, k))
    ref = jax.block_until_ready(_l1attn_reference(q, k))
    assert attn.shape == (B, T, T, H), attn.shape
    assert jnp.allclose(attn, ref, atol=1e-5, rtol=1e-5), "f32 mismatch vs reference"

    # 2) bf16, T not a multiple of 128: multi-tile grid, token padding,
    #    fori_loop accumulator chunking, packed-bf16 pair path, native layout.
    B2, T2, H2, W2 = 1, 160, 2, 16
    qb = jax.random.normal(k3, (B2, T2, H2, W2), dtype=jnp.bfloat16)
    kb = jax.random.normal(k4, (B2, T2, H2, W2), dtype=jnp.bfloat16)
    attn_b = jax.block_until_ready(l1attn(qb, kb, native_layout=True))
    ref_b = jnp.transpose(_l1attn_reference(qb, kb), (0, 3, 1, 2))  # [B, H, Tk, Tq]
    assert attn_b.shape == (B2, H2, T2, T2), attn_b.shape
    assert jnp.allclose(attn_b.astype(jnp.float32), ref_b, atol=0.2, rtol=0.05), \
        "bf16 mismatch vs reference"

    print("KERNEL_OK")
</pallas_src>

<mosaic_0001>
module attributes {stable_mosaic.version = 11 : i64} {
  func.func @kernel(%arg0: i32, %arg1: i32, %arg2: i32, %arg3: i32, %arg4: memref<1x1x32x128xf32, #tpu.memory_space<vmem>>, %arg5: memref<1x1x8x32xf32, #tpu.memory_space<vmem>>, %arg6: memref<1x1x8x128xf32, #tpu.memory_space<vmem>>) attributes {dimension_semantics = [#tpu.dimension_semantics<parallel>, #tpu.dimension_semantics<parallel>, #tpu.dimension_semantics<parallel>, #tpu.dimension_semantics<parallel>], iteration_bounds = array<i64: 2, 4, 1, 1>, scalar_prefetch = 0 : i64, scratch_operands = 0 : i64, tpu.core_type = #tpu.core_type<tc>, window_params = [{transform_indices = @transform_0, window_bounds = array<i64: 1, 1, 32, 128>}, {transform_indices = @transform_1, window_bounds = array<i64: 1, 1, 8, 32>}, {transform_indices = @transform_2, window_bounds = array<i64: 1, 1, 8, 128>}]} {
    %cst = arith.constant 0.000000e+00 : f32
    %0 = vector.broadcast %cst : f32 to vector<8x128xf32>
    %c0 = arith.constant 0 : index
    %c0_0 = arith.constant 0 : index
    %c0_1 = arith.constant 0 : index
    %c0_2 = arith.constant 0 : index
    %1 = vector.load %arg4[%c0, %c0_0, %c0_1, %c0_2] : memref<1x1x32x128xf32, #tpu.memory_space<vmem>>, vector<1x1x1x128xf32>
    %2 = vector.shape_cast %1 : vector<1x1x1x128xf32> to vector<1x128xf32>
    %c0_3 = arith.constant 0 : index
    %c0_4 = arith.constant 0 : index
    %c0_5 = arith.constant 0 : index
    %c0_6 = arith.constant 0 : index
    %3 = vector.load %arg5[%c0_3, %c0_4, %c0_5, %c0_6] : memref<1x1x8x32xf32, #tpu.memory_space<vmem>>, vector<1x1x8x1xf32>
    %4 = vector.shape_cast %3 : vector<1x1x8x1xf32> to vector<8x1xf32>
    %5 = vector.broadcast %2 : vector<1x128xf32> to vector<8x128xf32>
    %6 = vector.broadcast %4 : vector<8x1xf32> to vector<8x128xf32>
    %7 = arith.subf %5, %6 : vector<8x128xf32>
    %8 = math.absf %7 : vector<8x128xf32>
    %9 = arith.addf %0, %8 : vector<8x128xf32>
    %c0_7 = arith.constant 0 : index
    %c0_8 = arith.constant 0 : index
    %c1 = arith.constant 1 : index
    %c0_9 = arith.constant 0 : index
    %10 = vector.load %arg4[%c0_7, %c0_8, %c1, %c0_9] : memref<1x1x32x128xf32, #tpu.memory_space<vmem>>, vector<1x1x1x128xf32>
    %11 = vector.shape_cast %10 : vector<1x1x1x128xf32> to vector<1x128xf32>
    %c0_10 = arith.constant 0 : index
    %c0_11 = arith.constant 0 : index
    %c0_12 = arith.constant 0 : index
    %c1_13 = arith.constant 1 : index
    %12 = vector.load %arg5[%c0_10, %c0_11, %c0_12, %c1_13] : memref<1x1x8x32xf32, #tpu.memory_space<vmem>>, vector<1x1x8x1xf32>
    %13 = vector.shape_cast %12 : vector<1x1x8x1xf32> to vector<8x1xf32>
    %14 = vector.broadcast %11 : vector<1x128xf32> to vector<8x128xf32>
    %15 = vector.broadcast %13 : vector<8x1xf32> to vector<8x128xf32>
    %16 = arith.subf %14, %15 : vector<8x128xf32>
    %17 = math.absf %16 : vector<8x128xf32>
    %18 = arith.addf %9, %17 : vector<8x128xf32>
    %c0_14 = arith.constant 0 : index
    %c0_15 = arith.constant 0 : index
    %c2 = arith.constant 2 : index
    %c0_16 = arith.constant 0 : index
    %19 = vector.load %arg4[%c0_14, %c0_15, %c2, %c0_16] : memref<1x1x32x128xf32, #tpu.memory_space<vmem>>, vector<1x1x1x128xf32>
    %20 = vector.shape_cast %19 : vector<1x1x1x128xf32> to vector<1x128xf32>
    %c0_17 = arith.constant 0 : index
    %c0_18 = arith.constant 0 : index
    %c0_19 = arith.constant 0 : index
    %c2_20 = arith.constant 2 : index
    %21 = vector.load %arg5[%c0_17, %c0_18, %c0_19, %c2_20] : memref<1x1x8x32xf32, #tpu.memory_space<vmem>>, vector<1x1x8x1xf32>
    %22 = vector.shape_cast %21 : vector<1x1x8x1xf32> to vector<8x1xf32>
    %23 = vector.broadcast %20 : vector<1x128xf32> to vector<8x128xf32>
    %24 = vector.broadcast %22 : vector<8x1xf32> to vector<8x128xf32>
    %25 = arith.subf %23, %24 : vector<8x128xf32>
    %26 = math.absf %25 : vector<8x128xf32>
    %27 = arith.addf %18, %26 : vector<8x128xf32>
    %c0_21 = arith.constant 0 : index
    %c0_22 = arith.constant 0 : index
    %c3 = arith.constant 3 : index
    %c0_23 = arith.constant 0 : index
    %28 = vector.load %arg4[%c0_21, %c0_22, %c3, %c0_23] : memref<1x1x32x128xf32, #tpu.memory_space<vmem>>, vector<1x1x1x128xf32>
    %29 = vector.shape_cast %28 : vector<1x1x1x128xf32> to vector<1x128xf32>
    %c0_24 = arith.constant 0 : index
    %c0_25 = arith.constant 0 : index
    %c0_26 = arith.constant 0 : index
    %c3_27 = arith.constant 3 : index
    %30 = vector.load %arg5[%c0_24, %c0_25, %c0_26, %c3_27] : memref<1x1x8x32xf32, #tpu.memory_space<vmem>>, vector<1x1x8x1xf32>
    %31 = vector.shape_cast %30 : vector<1x1x8x1xf32> to vector<8x1xf32>
    %32 = vector.broadcast %29 : vector<1x128xf32> to vector<8x128xf32>
    %33 = vector.broadcast %31 : vector<8x1xf32> to vector<8x128xf32>
    %34 = arith.subf %32, %33 : vector<8x128xf32>
    %35 = math.absf %34 : vector<8x128xf32>
    %36 = arith.addf %27, %35 : vector<8x128xf32>
    %c0_28 = arith.constant 0 : index
    %c0_29 = arith.constant 0 : index
    %c4 = arith.constant 4 : index
    %c0_30 = arith.constant 0 : index
    %37 = vector.load %arg4[%c0_28, %c0_29, %c4, %c0_30] : memref<1x1x32x128xf32, #tpu.memory_space<vmem>>, vector<1x1x1x128xf32>
    %38 = vector.shape_cast %37 : vector<1x1x1x128xf32> to vector<1x128xf32>
    %c0_31 = arith.constant 0 : index
    %c0_32 = arith.constant 0 : index
    %c0_33 = arith.constant 0 : index
    %c4_34 = arith.constant 4 : index
    %39 = vector.load %arg5[%c0_31, %c0_32, %c0_33, %c4_34] : memref<1x1x8x32xf32, #tpu.memory_space<vmem>>, vector<1x1x8x1xf32>
    %40 = vector.shape_cast %39 : vector<1x1x8x1xf32> to vector<8x1xf32>
    %41 = vector.broadcast %38 : vector<1x128xf32> to vector<8x128xf32>
    %42 = vector.broadcast %40 : vector<8x1xf32> to vector<8x128xf32>
    %43 = arith.subf %41, %42 : vector<8x128xf32>
    %44 = math.absf %43 : vector<8x128xf32>
    %45 = arith.addf %36, %44 : vector<8x128xf32>
    %c0_35 = arith.constant 0 : index
    %c0_36 = arith.constant 0 : index
    %c5 = arith.constant 5 : index
    %c0_37 = arith.constant 0 : index
    %46 = vector.load %arg4[%c0_35, %c0_36, %c5, %c0_37] : memref<1x1x32x128xf32, #tpu.memory_space<vmem>>, vector<1x1x1x128xf32>
    %47 = vector.shape_cast %46 : vector<1x1x1x128xf32> to vector<1x128xf32>
    %c0_38 = arith.constant 0 : index
    %c0_39 = arith.constant 0 : index
    %c0_40 = arith.constant 0 : index
    %c5_41 = arith.constant 5 : index
    %48 = vector.load %arg5[%c0_38, %c0_39, %c0_40, %c5_41] : memref<1x1x8x32xf32, #tpu.memory_space<vmem>>, vector<1x1x8x1xf32>
    %49 = vector.shape_cast %48 : vector<1x1x8x1xf32> to vector<8x1xf32>
    %50 = vector.broadcast %47 : vector<1x128xf32> to vector<8x128xf32>
    %51 = vector.broadcast %49 : vector<8x1xf32> to vector<8x128xf32>
    %52 = arith.subf %50, %51 : vector<8x128xf32>
    %53 = math.absf %52 : vector<8x128xf32>
    %54 = arith.addf %45, %53 : vector<8x128xf32>
    %c0_42 = arith.constant 0 : index
    %c0_43 = arith.constant 0 : index
    %c6 = arith.constant 6 : index
    %c0_44 = arith.constant 0 : index
    %55 = vector.load %arg4[%c0_42, %c0_43, %c6, %c0_44] : memref<1x1x32x128xf32, #tpu.memory_space<vmem>>, vector<1x1x1x128xf32>
    %56 = vector.shape_cast %55 : vector<1x1x1x128xf32> to vector<1x128xf32>
    %c0_45 = arith.constant 0 : index
    %c0_46 = arith.constant 0 : index
    %c0_47 = arith.constant 0 : index
    %c6_48 = arith.constant 6 : index
    %57 = vector.load %arg5[%c0_45, %c0_46, %c0_47, %c6_48] : memref<1x1x8x32xf32, #tpu.memory_space<vmem>>, vector<1x1x8x1xf32>
    %58 = vector.shape_cast %57 : vector<1x1x8x1xf32> to vector<8x1xf32>
    %59 = vector.broadcast %56 : vector<1x128xf32> to vector<8x128xf32>
    %60 = vector.broadcast %58 : vector<8x1xf32> to vector<8x128xf32>
    %61 = arith.subf %59, %60 : vector<8x128xf32>
    %62 = math.absf %61 : vector<8x128xf32>
    %63 = arith.addf %54, %62 : vector<8x128xf32>
    %c0_49 = arith.constant 0 : index
    %c0_50 = arith.constant 0 : index
    %c7 = arith.constant 7 : index
    %c0_51 = arith.constant 0 : index
    %64 = vector.load %arg4[%c0_49, %c0_50, %c7, %c0_51] : memref<1x1x32x128xf32, #tpu.memory_space<vmem>>, vector<1x1x1x128xf32>
    %65 = vector.shape_cast %64 : vector<1x1x1x128xf32> to vector<1x128xf32>
    %c0_52 = arith.constant 0 : index
    %c0_53 = arith.constant 0 : index
    %c0_54 = arith.constant 0 : index
    %c7_55 = arith.constant 7 : index
    %66 = vector.load %arg5[%c0_52, %c0_53, %c0_54, %c7_55] : memref<1x1x8x32xf32, #tpu.memory_space<vmem>>, vector<1x1x8x1xf32>
    %67 = vector.shape_cast %66 : vector<1x1x8x1xf32> to vector<8x1xf32>
    %68 = vector.broadcast %65 : vector<1x128xf32> to vector<8x128xf32>
    %69 = vector.broadcast %67 : vector<8x1xf32> to vector<8x128xf32>
    %70 = arith.subf %68, %69 : vector<8x128xf32>
    %71 = math.absf %70 : vector<8x128xf32>
    %72 = arith.addf %63, %71 : vector<8x128xf32>
    %c0_56 = arith.constant 0 : index
    %c0_57 = arith.constant 0 : index
    %c8 = arith.constant 8 : index
    %c0_58 = arith.constant 0 : index
    %73 = vector.load %arg4[%c0_56, %c0_57, %c8, %c0_58] : memref<1x1x32x128xf32, #tpu.memory_space<vmem>>, vector<1x1x1x128xf32>
    %74 = vector.shape_cast %73 : vector<1x1x1x128xf32> to vector<1x128xf32>
    %c0_59 = arith.constant 0 : index
    %c0_60 = arith.constant 0 : index
    %c0_61 = arith.constant 0 : index
    %c8_62 = arith.constant 8 : index
    %75 = vector.load %arg5[%c0_59, %c0_60, %c0_61, %c8_62] : memref<1x1x8x32xf32, #tpu.memory_space<vmem>>, vector<1x1x8x1xf32>
    %76 = vector.shape_cast %75 : vector<1x1x8x1xf32> to vector<8x1xf32>
    %77 = vector.broadcast %74 : vector<1x128xf32> to vector<8x128xf32>
    %78 = vector.broadcast %76 : vector<8x1xf32> to vector<8x128xf32>
    %79 = arith.subf %77, %78 : vector<8x128xf32>
    %80 = math.absf %79 : vector<8x128xf32>
    %81 = arith.addf %72, %80 : vector<8x128xf32>
    %c0_63 = arith.constant 0 : index
    %c0_64 = arith.constant 0 : index
    %c9 = arith.constant 9 : index
    %c0_65 = arith.constant 0 : index
    %82 = vector.load %arg4[%c0_63, %c0_64, %c9, %c0_65] : memref<1x1x32x128xf32, #tpu.memory_space<vmem>>, vector<1x1x1x128xf32>
    %83 = vector.shape_cast %82 : vector<1x1x1x128xf32> to vector<1x128xf32>
    %c0_66 = arith.constant 0 : index
    %c0_67 = arith.constant 0 : index
    %c0_68 = arith.constant 0 : index
    %c9_69 = arith.constant 9 : index
    %84 = vector.load %arg5[%c0_66, %c0_67, %c0_68, %c9_69] : memref<1x1x8x32xf32, #tpu.memory_space<vmem>>, vector<1x1x8x1xf32>
    %85 = vector.shape_cast %84 : vector<1x1x8x1xf32> to vector<8x1xf32>
    %86 = vector.broadcast %83 : vector<1x128xf32> to vector<8x128xf32>
    %87 = vector.broadcast %85 : vector<8x1xf32> to vector<8x128xf32>
    %88 = arith.subf %86, %87 : vector<8x128xf32>
    %89 = math.absf %88 : vector<8x128xf32>
    %90 = arith.addf %81, %89 : vector<8x128xf32>
    %c0_70 = arith.constant 0 : index
    %c0_71 = arith.constant 0 : index
    %c10 = arith.constant 10 : index
    %c0_72 = arith.constant 0 : index
    %91 = vector.load %arg4[%c0_70, %c0_71, %c10, %c0_72] : memref<1x1x32x128xf32, #tpu.memory_space<vmem>>, vector<1x1x1x128xf32>
    %92 = vector.shape_cast %91 : vector<1x1x1x128xf32> to vector<1x128xf32>
    %c0_73 = arith.constant 0 : index
    %c0_74 = arith.constant 0 : index
    %c0_75 = arith.constant 0 : index
    %c10_76 = arith.constant 10 : index
    %93 = vector.load %arg5[%c0_73, %c0_74, %c0_75, %c10_76] : memref<1x1x8x32xf32, #tpu.memory_space<vmem>>, vector<1x1x8x1xf32>
    %94 = vector.shape_cast %93 : vector<1x1x8x1xf32> to vector<8x1xf32>
    %95 = vector.broadcast %92 : vector<1x128xf32> to vector<8x128xf32>
    %96 = vector.broadcast %94 : vector<8x1xf32> to vector<8x128xf32>
    %97 = arith.subf %95, %96 : vector<8x128xf32>
    %98 = math.absf %97 : vector<8x128xf32>
    %99 = arith.addf %90, %98 : vector<8x128xf32>
    %c0_77 = arith.constant 0 : index
    %c0_78 = arith.constant 0 : index
    %c11 = arith.constant 11 : index
    %c0_79 = arith.constant 0 : index
    %100 = vector.load %arg4[%c0_77, %c0_78, %c11, %c0_79] : memref<1x1x32x128xf32, #tpu.memory_space<vmem>>, vector<1x1x1x128xf32>
    %101 = vector.shape_cast %100 : vector<1x1x1x128xf32> to vector<1x128xf32>
    %c0_80 = arith.constant 0 : index
    %c0_81 = arith.constant 0 : index
    %c0_82 = arith.constant 0 : index
    %c11_83 = arith.constant 11 : index
    %102 = vector.load %arg5[%c0_80, %c0_81, %c0_82, %c11_83] : memref<1x1x8x32xf32, #tpu.memory_space<vmem>>, vector<1x1x8x1xf32>
    %103 = vector.shape_cast %102 : vector<1x1x8x1xf32> to vector<8x1xf32>
    %104 = vector.broadcast %101 : vector<1x128xf32> to vector<8x128xf32>
    %105 = vector.broadcast %103 : vector<8x1xf32> to vector<8x128xf32>
    %106 = arith.subf %104, %105 : vector<8x128xf32>
    %107 = math.absf %106 : vector<8x128xf32>
    %108 = arith.addf %99, %107 : vector<8x128xf32>
    %c0_84 = arith.constant 0 : index
    %c0_85 = arith.constant 0 : index
    %c12 = arith.constant 12 : index
    %c0_86 = arith.constant 0 : index
    %109 = vector.load %arg4[%c0_84, %c0_85, %c12, %c0_86] : memref<1x1x32x128xf32, #tpu.memory_space<vmem>>, vector<1x1x1x128xf32>
    %110 = vector.shape_cast %109 : vector<1x1x1x128xf32> to vector<1x128xf32>
    %c0_87 = arith.constant 0 : index
    %c0_88 = arith.constant 0 : index
    %c0_89 = arith.constant 0 : index
    %c12_90 = arith.constant 12 : index
    %111 = vector.load %arg5[%c0_87, %c0_88, %c0_89, %c12_90] : memref<1x1x8x32xf32, #tpu.memory_space<vmem>>, vector<1x1x8x1xf32>
    %112 = vector.shape_cast %111 : vector<1x1x8x1xf32> to vector<8x1xf32>
    %113 = vector.broadcast %110 : vector<1x128xf32> to vector<8x128xf32>
    %114 = vector.broadcast %112 : vector<8x1xf32> to vector<8x128xf32>
    %115 = arith.subf %113, %114 : vector<8x128xf32>
    %116 = math.absf %115 : vector<8x128xf32>
    %117 = arith.addf %108, %116 : vector<8x128xf32>
    %c0_91 = arith.constant 0 : index
    %c0_92 = arith.constant 0 : index
    %c13 = arith.constant 13 : index
    %c0_93 = arith.constant 0 : index
    %118 = vector.load %arg4[%c0_91, %c0_92, %c13, %c0_93] : memref<1x1x32x128xf32, #tpu.memory_space<vmem>>, vector<1x1x1x128xf32>
    %119 = vector.shape_cast %118 : vector<1x1x1x128xf32> to vector<1x128xf32>
    %c0_94 = arith.constant 0 : index
    %c0_95 = arith.constant 0 : index
    %c0_96 = arith.constant 0 : index
    %c13_97 = arith.constant 13 : index
    %120 = vector.load %arg5[%c0_94, %c0_95, %c0_96, %c13_97] : memref<1x1x8x32xf32, #tpu.memory_space<vmem>>, vector<1x1x8x1xf32>
    %121 = vector.shape_cast %120 : vector<1x1x8x1xf32> to vector<8x1xf32>
    %122 = vector.broadcast %119 : vector<1x128xf32> to vector<8x128xf32>
    %123 = vector.broadcast %121 : vector<8x1xf32> to vector<8x128xf32>
    %124 = arith.subf %122, %123 : vector<8x128xf32>
    %125 = math.absf %124 : vector<8x128xf32>
    %126 = arith.addf %117, %125 : vector<8x128xf32>
    %c0_98 = arith.constant 0 : index
    %c0_99 = arith.constant 0 : index
    %c14 = arith.constant 14 : index
    %c0_100 = arith.constant 0 : index
    %127 = vector.load %arg4[%c0_98, %c0_99, %c14, %c0_100] : memref<1x1x32x128xf32, #tpu.memory_space<vmem>>, vector<1x1x1x128xf32>
    %128 = vector.shape_cast %127 : vector<1x1x1x128xf32> to vector<1x128xf32>
    %c0_101 = arith.constant 0 : index
    %c0_102 = arith.constant 0 : index
    %c0_103 = arith.constant 0 : index
    %c14_104 = arith.constant 14 : index
    %129 = vector.load %arg5[%c0_101, %c0_102, %c0_103, %c14_104] : memref<1x1x8x32xf32, #tpu.memory_space<vmem>>, vector<1x1x8x1xf32>
    %130 = vector.shape_cast %129 : vector<1x1x8x1xf32> to vector<8x1xf32>
    %131 = vector.broadcast %128 : vector<1x128xf32> to vector<8x128xf32>
    %132 = vector.broadcast %130 : vector<8x1xf32> to vector<8x128xf32>
    %133 = arith.subf %131, %132 : vector<8x128xf32>
    %134 = math.absf %133 : vector<8x128xf32>
    %135 = arith.addf %126, %134 : vector<8x128xf32>
    %c0_105 = arith.constant 0 : index
    %c0_106 = arith.constant 0 : index
    %c15 = arith.constant 15 : index
    %c0_107 = arith.constant 0 : index
    %136 = vector.load %arg4[%c0_105, %c0_106, %c15, %c0_107] : memref<1x1x32x128xf32, #tpu.memory_space<vmem>>, vector<1x1x1x128xf32>
    %137 = vector.shape_cast %136 : vector<1x1x1x128xf32> to vector<1x128xf32>
    %c0_108 = arith.constant 0 : index
    %c0_109 = arith.constant 0 : index
    %c0_110 = arith.constant 0 : index
    %c15_111 = arith.constant 15 : index
    %138 = vector.load %arg5[%c0_108, %c0_109, %c0_110, %c15_111] : memref<1x1x8x32xf32, #tpu.memory_space<vmem>>, vector<1x1x8x1xf32>
    %139 = vector.shape_cast %138 : vector<1x1x8x1xf32> to vector<8x1xf32>
    %140 = vector.broadcast %137 : vector<1x128xf32> to vector<8x128xf32>
    %141 = vector.broadcast %139 : vector<8x1xf32> to vector<8x128xf32>
    %142 = arith.subf %140, %141 : vector<8x128xf32>
    %143 = math.absf %142 : vector<8x128xf32>
    %144 = arith.addf %135, %143 : vector<8x128xf32>
    %c0_112 = arith.constant 0 : index
    %c0_113 = arith.constant 0 : index
    %c16 = arith.constant 16 : index
    %c0_114 = arith.constant 0 : index
    %145 = vector.load %arg4[%c0_112, %c0_113, %c16, %c0_114] : memref<1x1x32x128xf32, #tpu.memory_space<vmem>>, vector<1x1x1x128xf32>
    %146 = vector.shape_cast %145 : vector<1x1x1x128xf32> to vector<1x128xf32>
    %c0_115 = arith.constant 0 : index
    %c0_116 = arith.constant 0 : index
    %c0_117 = arith.constant 0 : index
    %c16_118 = arith.constant 16 : index
    %147 = vector.load %arg5[%c0_115, %c0_116, %c0_117, %c16_118] : memref<1x1x8x32xf32, #tpu.memory_space<vmem>>, vector<1x1x8x1xf32>
    %148 = vector.shape_cast %147 : vector<1x1x8x1xf32> to vector<8x1xf32>
    %149 = vector.broadcast %146 : vector<1x128xf32> to vector<8x128xf32>
    %150 = vector.broadcast %148 : vector<8x1xf32> to vector<8x128xf32>
    %151 = arith.subf %149, %150 : vector<8x128xf32>
    %152 = math.absf %151 : vector<8x128xf32>
    %153 = arith.addf %144, %152 : vector<8x128xf32>
    %c0_119 = arith.constant 0 : index
    %c0_120 = arith.constant 0 : index
    %c17 = arith.constant 17 : index
    %c0_121 = arith.constant 0 : index
    %154 = vector.load %arg4[%c0_119, %c0_120, %c17, %c0_121] : memref<1x1x32x128xf32, #tpu.memory_space<vmem>>, vector<1x1x1x128xf32>
    %155 = vector.shape_cast %154 : vector<1x1x1x128xf32> to vector<1x128xf32>
    %c0_122 = arith.constant 0 : index
    %c0_123 = arith.constant 0 : index
    %c0_124 = arith.constant 0 : index
    %c17_125 = arith.constant 17 : index
    %156 = vector.load %arg5[%c0_122, %c0_123, %c0_124, %c17_125] : memref<1x1x8x32xf32, #tpu.memory_space<vmem>>, vector<1x1x8x1xf32>
    %157 = vector.shape_cast %156 : vector<1x1x8x1xf32> to vector<8x1xf32>
    %158 = vector.broadcast %155 : vector<1x128xf32> to vector<8x128xf32>
    %159 = vector.broadcast %157 : vector<8x1xf32> to vector<8x128xf32>
    %160 = arith.subf %158, %159 : vector<8x128xf32>
    %161 = math.absf %160 : vector<8x128xf32>
    %162 = arith.addf %153, %161 : vector<8x128xf32>
    %c0_126 = arith.constant 0 : index
    %c0_127 = arith.constant 0 : index
    %c18 = arith.constant 18 : index
    %c0_128 = arith.constant 0 : index
    %163 = vector.load %arg4[%c0_126, %c0_127, %c18, %c0_128] : memref<1x1x32x128xf32, #tpu.memory_space<vmem>>, vector<1x1x1x128xf32>
    %164 = vector.shape_cast %163 : vector<1x1x1x128xf32> to vector<1x128xf32>
    %c0_129 = arith.constant 0 : index
    %c0_130 = arith.constant 0 : index
    %c0_131 = arith.constant 0 : index
    %c18_132 = arith.constant 18 : index
    %165 = vector.load %arg5[%c0_129, %c0_130, %c0_131, %c18_132] : memref<1x1x8x32xf32, #tpu.memory_space<vmem>>, vector<1x1x8x1xf32>
    %166 = vector.shape_cast %165 : vector<1x1x8x1xf32> to vector<8x1xf32>
    %167 = vector.broadcast %164 : vector<1x128xf32> to vector<8x128xf32>
    %168 = vector.broadcast %166 : vector<8x1xf32> to vector<8x128xf32>
    %169 = arith.subf %167, %168 : vector<8x128xf32>
    %170 = math.absf %169 : vector<8x128xf32>
    %171 = arith.addf %162, %170 : vector<8x128xf32>
    %c0_133 = arith.constant 0 : index
    %c0_134 = arith.constant 0 : index
    %c19 = arith.constant 19 : index
    %c0_135 = arith.constant 0 : index
    %172 = vector.load %arg4[%c0_133, %c0_134, %c19, %c0_135] : memref<1x1x32x128xf32, #tpu.memory_space<vmem>>, vector<1x1x1x128xf32>
    %173 = vector.shape_cast %172 : vector<1x1x1x128xf32> to vector<1x128xf32>
    %c0_136 = arith.constant 0 : index
    %c0_137 = arith.constant 0 : index
    %c0_138 = arith.constant 0 : index
    %c19_139 = arith.constant 19 : index
    %174 = vector.load %arg5[%c0_136, %c0_137, %c0_138, %c19_139] : memref<1x1x8x32xf32, #tpu.memory_space<vmem>>, vector<1x1x8x1xf32>
    %175 = vector.shape_cast %174 : vector<1x1x8x1xf32> to vector<8x1xf32>
    %176 = vector.broadcast %173 : vector<1x128xf32> to vector<8x128xf32>
    %177 = vector.broadcast %175 : vector<8x1xf32> to vector<8x128xf32>
    %178 = arith.subf %176, %177 : vector<8x128xf32>
    %179 = math.absf %178 : vector<8x128xf32>
    %180 = arith.addf %171, %179 : vector<8x128xf32>
    %c0_140 = arith.constant 0 : index
    %c0_141 = arith.constant 0 : index
    %c20 = arith.constant 20 : index
    %c0_142 = arith.constant 0 : index
    %181 = vector.load %arg4[%c0_140, %c0_141, %c20, %c0_142] : memref<1x1x32x128xf32, #tpu.memory_space<vmem>>, vector<1x1x1x128xf32>
    %182 = vector.shape_cast %181 : vector<1x1x1x128xf32> to vector<1x128xf32>
    %c0_143 = arith.constant 0 : index
    %c0_144 = arith.constant 0 : index
    %c0_145 = arith.constant 0 : index
    %c20_146 = arith.constant 20 : index
    %183 = vector.load %arg5[%c0_143, %c0_144, %c0_145, %c20_146] : memref<1x1x8x32xf32, #tpu.memory_space<vmem>>, vector<1x1x8x1xf32>
    %184 = vector.shape_cast %183 : vector<1x1x8x1xf32> to vector<8x1xf32>
    %185 = vector.broadcast %182 : vector<1x128xf32> to vector<8x128xf32>
    %186 = vector.broadcast %184 : vector<8x1xf32> to vector<8x128xf32>
    %187 = arith.subf %185, %186 : vector<8x128xf32>
    %188 = math.absf %187 : vector<8x128xf32>
    %189 = arith.addf %180, %188 : vector<8x128xf32>
    %c0_147 = arith.constant 0 : index
    %c0_148 = arith.constant 0 : index
    %c21 = arith.constant 21 : index
    %c0_149 = arith.constant 0 : index
    %190 = vector.load %arg4[%c0_147, %c0_148, %c21, %c0_149] : memref<1x1x32x128xf32, #tpu.memory_space<vmem>>, vector<1x1x1x128xf32>
    %191 = vector.shape_cast %190 : vector<1x1x1x128xf32> to vector<1x128xf32>
    %c0_150 = arith.constant 0 : index
    %c0_151 = arith.constant 0 : index
    %c0_152 = arith.constant 0 : index
    %c21_153 = arith.constant 21 : index
    %192 = vector.load %arg5[%c0_150, %c0_151, %c0_152, %c21_153] : memref<1x1x8x32xf32, #tpu.memory_space<vmem>>, vector<1x1x8x1xf32>
    %193 = vector.shape_cast %192 : vector<1x1x8x1xf32> to vector<8x1xf32>
    %194 = vector.broadcast %191 : vector<1x128xf32> to vector<8x128xf32>
    %195 = vector.broadcast %193 : vector<8x1xf32> to vector<8x128xf32>
    %196 = arith.subf %194, %195 : vector<8x128xf32>
    %197 = math.absf %196 : vector<8x128xf32>
    %198 = arith.addf %189, %197 : vector<8x128xf32>
    %c0_154 = arith.constant 0 : index
    %c0_155 = arith.constant 0 : index
    %c22 = arith.constant 22 : index
    %c0_156 = arith.constant 0 : index
    %199 = vector.load %arg4[%c0_154, %c0_155, %c22, %c0_156] : memref<1x1x32x128xf32, #tpu.memory_space<vmem>>, vector<1x1x1x128xf32>
    %200 = vector.shape_cast %199 : vector<1x1x1x128xf32> to vector<1x128xf32>
    %c0_157 = arith.constant 0 : index
    %c0_158 = arith.constant 0 : index
    %c0_159 = arith.constant 0 : index
    %c22_160 = arith.constant 22 : index
    %201 = vector.load %arg5[%c0_157, %c0_158, %c0_159, %c22_160] : memref<1x1x8x32xf32, #tpu.memory_space<vmem>>, vector<1x1x8x1xf32>
    %202 = vector.shape_cast %201 : vector<1x1x8x1xf32> to vector<8x1xf32>
    %203 = vector.broadcast %200 : vector<1x128xf32> to vector<8x128xf32>
    %204 = vector.broadcast %202 : vector<8x1xf32> to vector<8x128xf32>
    %205 = arith.subf %203, %204 : vector<8x128xf32>
    %206 = math.absf %205 : vector<8x128xf32>
    %207 = arith.addf %198, %206 : vector<8x128xf32>
    %c0_161 = arith.constant 0 : index
    %c0_162 = arith.constant 0 : index
    %c23 = arith.constant 23 : index
    %c0_163 = arith.constant 0 : index
    %208 = vector.load %arg4[%c0_161, %c0_162, %c23, %c0_163] : memref<1x1x32x128xf32, #tpu.memory_space<vmem>>, vector<1x1x1x128xf32>
    %209 = vector.shape_cast %208 : vector<1x1x1x128xf32> to vector<1x128xf32>
    %c0_164 = arith.constant 0 : index
    %c0_165 = arith.constant 0 : index
    %c0_166 = arith.constant 0 : index
    %c23_167 = arith.constant 23 : index
    %210 = vector.load %arg5[%c0_164, %c0_165, %c0_166, %c23_167] : memref<1x1x8x32xf32, #tpu.memory_space<vmem>>, vector<1x1x8x1xf32>
    %211 = vector.shape_cast %210 : vector<1x1x8x1xf32> to vector<8x1xf32>
    %212 = vector.broadcast %209 : vector<1x128xf32> to vector<8x128xf32>
    %213 = vector.broadcast %211 : vector<8x1xf32> to vector<8x128xf32>
    %214 = arith.subf %212, %213 : vector<8x128xf32>
    %215 = math.absf %214 : vector<8x128xf32>
    %216 = arith.addf %207, %215 : vector<8x128xf32>
    %c0_168 = arith.constant 0 : index
    %c0_169 = arith.constant 0 : index
    %c24 = arith.constant 24 : index
    %c0_170 = arith.constant 0 : index
    %217 = vector.load %arg4[%c0_168, %c0_169, %c24, %c0_170] : memref<1x1x32x128xf32, #tpu.memory_space<vmem>>, vector<1x1x1x128xf32>
    %218 = vector.shape_cast %217 : vector<1x1x1x128xf32> to vector<1x128xf32>
    %c0_171 = arith.constant 0 : index
    %c0_172 = arith.constant 0 : index
    %c0_173 = arith.constant 0 : index
    %c24_174 = arith.constant 24 : index
    %219 = vector.load %arg5[%c0_171, %c0_172, %c0_173, %c24_174] : memref<1x1x8x32xf32, #tpu.memory_space<vmem>>, vector<1x1x8x1xf32>
    %220 = vector.shape_cast %219 : vector<1x1x8x1xf32> to vector<8x1xf32>
    %221 = vector.broadcast %218 : vector<1x128xf32> to vector<8x128xf32>
    %222 = vector.broadcast %220 : vector<8x1xf32> to vector<8x128xf32>
    %223 = arith.subf %221, %222 : vector<8x128xf32>
    %224 = math.absf %223 : vector<8x128xf32>
    %225 = arith.addf %216, %224 : vector<8x128xf32>
    %c0_175 = arith.constant 0 : index
    %c0_176 = arith.constant 0 : index
    %c25 = arith.constant 25 : index
    %c0_177 = arith.constant 0 : index
    %226 = vector.load %arg4[%c0_175, %c0_176, %c25, %c0_177] : memref<1x1x32x128xf32, #tpu.memory_space<vmem>>, vector<1x1x1x128xf32>
    %227 = vector.shape_cast %226 : vector<1x1x1x128xf32> to vector<1x128xf32>
    %c0_178 = arith.constant 0 : index
    %c0_179 = arith.constant 0 : index
    %c0_180 = arith.constant 0 : index
    %c25_181 = arith.constant 25 : index
    %228 = vector.load %arg5[%c0_178, %c0_179, %c0_180, %c25_181] : memref<1x1x8x32xf32, #tpu.memory_space<vmem>>, vector<1x1x8x1xf32>
    %229 = vector.shape_cast %228 : vector<1x1x8x1xf32> to vector<8x1xf32>
    %230 = vector.broadcast %227 : vector<1x128xf32> to vector<8x128xf32>
    %231 = vector.broadcast %229 : vector<8x1xf32> to vector<8x128xf32>
    %232 = arith.subf %230, %231 : vector<8x128xf32>
    %233 = math.absf %232 : vector<8x128xf32>
    %234 = arith.addf %225, %233 : vector<8x128xf32>
    %c0_182 = arith.constant 0 : index
    %c0_183 = arith.constant 0 : index
    %c26 = arith.constant 26 : index
    %c0_184 = arith.constant 0 : index
    %235 = vector.load %arg4[%c0_182, %c0_183, %c26, %c0_184] : memref<1x1x32x128xf32, #tpu.memory_space<vmem>>, vector<1x1x1x128xf32>
    %236 = vector.shape_cast %235 : vector<1x1x1x128xf32> to vector<1x128xf32>
    %c0_185 = arith.constant 0 : index
    %c0_186 = arith.constant 0 : index
    %c0_187 = arith.constant 0 : index
    %c26_188 = arith.constant 26 : index
    %237 = vector.load %arg5[%c0_185, %c0_186, %c0_187, %c26_188] : memref<1x1x8x32xf32, #tpu.memory_space<vmem>>, vector<1x1x8x1xf32>
    %238 = vector.shape_cast %237 : vector<1x1x8x1xf32> to vector<8x1xf32>
    %239 = vector.broadcast %236 : vector<1x128xf32> to vector<8x128xf32>
    %240 = vector.broadcast %238 : vector<8x1xf32> to vector<8x128xf32>
    %241 = arith.subf %239, %240 : vector<8x128xf32>
    %242 = math.absf %241 : vector<8x128xf32>
    %243 = arith.addf %234, %242 : vector<8x128xf32>
    %c0_189 = arith.constant 0 : index
    %c0_190 = arith.constant 0 : index
    %c27 = arith.constant 27 : index
    %c0_191 = arith.constant 0 : index
    %244 = vector.load %arg4[%c0_189, %c0_190, %c27, %c0_191] : memref<1x1x32x128xf32, #tpu.memory_space<vmem>>, vector<1x1x1x128xf32>
    %245 = vector.shape_cast %244 : vector<1x1x1x128xf32> to vector<1x128xf32>
    %c0_192 = arith.constant 0 : index
    %c0_193 = arith.constant 0 : index
    %c0_194 = arith.constant 0 : index
    %c27_195 = arith.constant 27 : index
    %246 = vector.load %arg5[%c0_192, %c0_193, %c0_194, %c27_195] : memref<1x1x8x32xf32, #tpu.memory_space<vmem>>, vector<1x1x8x1xf32>
    %247 = vector.shape_cast %246 : vector<1x1x8x1xf32> to vector<8x1xf32>
    %248 = vector.broadcast %245 : vector<1x128xf32> to vector<8x128xf32>
    %249 = vector.broadcast %247 : vector<8x1xf32> to vector<8x128xf32>
    %250 = arith.subf %248, %249 : vector<8x128xf32>
    %251 = math.absf %250 : vector<8x128xf32>
    %252 = arith.addf %243, %251 : vector<8x128xf32>
    %c0_196 = arith.constant 0 : index
    %c0_197 = arith.constant 0 : index
    %c28 = arith.constant 28 : index
    %c0_198 = arith.constant 0 : index
    %253 = vector.load %arg4[%c0_196, %c0_197, %c28, %c0_198] : memref<1x1x32x128xf32, #tpu.memory_space<vmem>>, vector<1x1x1x128xf32>
    %254 = vector.shape_cast %253 : vector<1x1x1x128xf32> to vector<1x128xf32>
    %c0_199 = arith.constant 0 : index
    %c0_200 = arith.constant 0 : index
    %c0_201 = arith.constant 0 : index
    %c28_202 = arith.constant 28 : index
    %255 = vector.load %arg5[%c0_199, %c0_200, %c0_201, %c28_202] : memref<1x1x8x32xf32, #tpu.memory_space<vmem>>, vector<1x1x8x1xf32>
    %256 = vector.shape_cast %255 : vector<1x1x8x1xf32> to vector<8x1xf32>
    %257 = vector.broadcast %254 : vector<1x128xf32> to vector<8x128xf32>
    %258 = vector.broadcast %256 : vector<8x1xf32> to vector<8x128xf32>
    %259 = arith.subf %257, %258 : vector<8x128xf32>
    %260 = math.absf %259 : vector<8x128xf32>
    %261 = arith.addf %252, %260 : vector<8x128xf32>
    %c0_203 = arith.constant 0 : index
    %c0_204 = arith.constant 0 : index
    %c29 = arith.constant 29 : index
    %c0_205 = arith.constant 0 : index
    %262 = vector.load %arg4[%c0_203, %c0_204, %c29, %c0_205] : memref<1x1x32x128xf32, #tpu.memory_space<vmem>>, vector<1x1x1x128xf32>
    %263 = vector.shape_cast %262 : vector<1x1x1x128xf32> to vector<1x128xf32>
    %c0_206 = arith.constant 0 : index
    %c0_207 = arith.constant 0 : index
    %c0_208 = arith.constant 0 : index
    %c29_209 = arith.constant 29 : index
    %264 = vector.load %arg5[%c0_206, %c0_207, %c0_208, %c29_209] : memref<1x1x8x32xf32, #tpu.memory_space<vmem>>, vector<1x1x8x1xf32>
    %265 = vector.shape_cast %264 : vector<1x1x8x1xf32> to vector<8x1xf32>
    %266 = vector.broadcast %263 : vector<1x128xf32> to vector<8x128xf32>
    %267 = vector.broadcast %265 : vector<8x1xf32> to vector<8x128xf32>
    %268 = arith.subf %266, %267 : vector<8x128xf32>
    %269 = math.absf %268 : vector<8x128xf32>
    %270 = arith.addf %261, %269 : vector<8x128xf32>
    %c0_210 = arith.constant 0 : index
    %c0_211 = arith.constant 0 : index
    %c30 = arith.constant 30 : index
    %c0_212 = arith.constant 0 : index
    %271 = vector.load %arg4[%c0_210, %c0_211, %c30, %c0_212] : memref<1x1x32x128xf32, #tpu.memory_space<vmem>>, vector<1x1x1x128xf32>
    %272 = vector.shape_cast %271 : vector<1x1x1x128xf32> to vector<1x128xf32>
    %c0_213 = arith.constant 0 : index
    %c0_214 = arith.constant 0 : index
    %c0_215 = arith.constant 0 : index
    %c30_216 = arith.constant 30 : index
    %273 = vector.load %arg5[%c0_213, %c0_214, %c0_215, %c30_216] : memref<1x1x8x32xf32, #tpu.memory_space<vmem>>, vector<1x1x8x1xf32>
    %274 = vector.shape_cast %273 : vector<1x1x8x1xf32> to vector<8x1xf32>
    %275 = vector.broadcast %272 : vector<1x128xf32> to vector<8x128xf32>
    %276 = vector.broadcast %274 : vector<8x1xf32> to vector<8x128xf32>
    %277 = arith.subf %275, %276 : vector<8x128xf32>
    %278 = math.absf %277 : vector<8x128xf32>
    %279 = arith.addf %270, %278 : vector<8x128xf32>
    %c0_217 = arith.constant 0 : index
    %c0_218 = arith.constant 0 : index
    %c31 = arith.constant 31 : index
    %c0_219 = arith.constant 0 : index
    %280 = vector.load %arg4[%c0_217, %c0_218, %c31, %c0_219] : memref<1x1x32x128xf32, #tpu.memory_space<vmem>>, vector<1x1x1x128xf32>
    %281 = vector.shape_cast %280 : vector<1x1x1x128xf32> to vector<1x128xf32>
    %c0_220 = arith.constant 0 : index
    %c0_221 = arith.constant 0 : index
    %c0_222 = arith.constant 0 : index
    %c31_223 = arith.constant 31 : index
    %282 = vector.load %arg5[%c0_220, %c0_221, %c0_222, %c31_223] : memref<1x1x8x32xf32, #tpu.memory_space<vmem>>, vector<1x1x8x1xf32>
    %283 = vector.shape_cast %282 : vector<1x1x8x1xf32> to vector<8x1xf32>
    %284 = vector.broadcast %281 : vector<1x128xf32> to vector<8x128xf32>
    %285 = vector.broadcast %283 : vector<8x1xf32> to vector<8x128xf32>
    %286 = arith.subf %284, %285 : vector<8x128xf32>
    %287 = math.absf %286 : vector<8x128xf32>
    %288 = arith.addf %279, %287 : vector<8x128xf32>
    %cst_224 = arith.constant -0.176776692 : f32
    %289 = vector.broadcast %cst_224 : f32 to vector<8x128xf32>
    %290 = arith.mulf %289, %288 : vector<8x128xf32>
    %c0_225 = arith.constant 0 : index
    %c0_226 = arith.constant 0 : index
    %c0_227 = arith.constant 0 : index
    %c0_228 = arith.constant 0 : index
    %291 = vector.load %arg6[%c0_225, %c0_226, %c0_227, %c0_228] : memref<1x1x8x128xf32, #tpu.memory_space<vmem>>, vector<1x1x8x128xf32>
    %292 = vector.shape_cast %291 : vector<1x1x8x128xf32> to vector<8x128xf32>
    %293 = vector.shape_cast %290 : vector<8x128xf32> to vector<1x1x8x128xf32>
    tpu.vector_store %arg6[%c0_225, %c0_226, %c0_227, %c0_228], %293 {strides = array<i32>} : memref<1x1x8x128xf32, #tpu.memory_space<vmem>>, vector<1x1x8x128xf32>,
    return
  }
  func.func @transform_0(%arg0: i32, %arg1: i32, %arg2: i32, %arg3: i32) -> (i32, i32, i32, i32) {
    %c0_i32 = arith.constant 0 : i32
    %c0_i32_0 = arith.constant 0 : i32
    return %arg0, %arg1, %c0_i32, %arg3 : i32, i32, i32, i32
  }
  func.func @transform_1(%arg0: i32, %arg1: i32, %arg2: i32, %arg3: i32) -> (i32, i32, i32, i32) {
    %c0_i32 = arith.constant 0 : i32
    %c0_i32_0 = arith.constant 0 : i32
    return %arg0, %arg1, %arg2, %c0_i32 : i32, i32, i32, i32
  }
  func.func @transform_2(%arg0: i32, %arg1: i32, %arg2: i32, %arg3: i32) -> (i32, i32, i32, i32) {
    %c0_i32 = arith.constant 0 : i32
    return %arg0, %arg1, %arg2, %arg3 : i32, i32, i32, i32
  }
}

</mosaic_0001>

<bundles_post_ra>
// kernel: tpu_custom_call.1
= control target key start
LH: loop header
LB: loop body
LE: loop exit
PB: predicated region body
PF: predicated region fallthrough
CT: control target
= control target key end

     0   :  { %s1336_s0 = inlined_call_operand.hbm [shape: f32[2,4,32,128], index: 0, kind: input, shape index: {}]   ;;  %s1337_s1 = inlined_call_operand.hbm [shape: f32[2,4,8,32], index: 1, kind: input, shape index: {}]   ;;  %s1338_s2 = inlined_call_operand.hbm [shape: f32[2,4,8,128], index: 2, kind: output, shape index: {}]  }
   0x1   :  { %1341 = sst [smem:[#allocation14_spill]] %s1336_s0 }
   0x2   :  { %7 = vsyncpa [#allocation3], 0 }
   0x3   :  { %9 = vsyncpa [#allocation3 + $0x1], 0 }
   0x4   :  { %10 = vsyncpa [#allocation6], 0 }
   0x5   :  { %12 = vsyncpa [#allocation6 + $0x1], 0 }
   0x6   :  { %13 = vsyncpa [#allocation4], 0 }
   0x7   :  { %15 = vsyncpa [#allocation4 + $0x1], 0  ;;  %s1097_s9 = smov 0   ;;  %s1099_s10 = smov 0  }
   0x8   :  { %s1101_s11 = smov 0   ;;  %s1103_s12 = smov 0  }
   0x9   :  { %s1105_s13 = smov 0   ;;  %s1107_s14 = smov 0  }
   0xa   :  { %s1109_s15 = smov 0   ;;  %s1111_s16 = smov 0  }
   0xb LB: > { %s682_s17 = sadd.s32 4294967295, %s1046_s16   ;;  %s683_s18 = sadd.s32 4294967294, %s1046_s16   ;;  %s1046_s16 = sphi %s1111_s16, %s21_s16   ;;  %s1042_s15 = sphi %s1109_s15, %s1360_s15   ;;  %s1038_s14 = sphi %s1107_s14, %s1359_s14   ;;  %s1034_s13 = sphi %s1105_s13, %s1358_s13   ;;  %s1030_s12 = sphi %s1103_s12, %s1357_s12   ;;  %s1026_s11 = sphi %s1101_s11, %s1356_s11   ;;  %s1022_s10 = sphi %s1099_s10, %s1355_s10   ;;  %s1018_s9 = sphi %s1097_s9, %s1354_s9  }
   0xc   : > { %s43_s19 = sadd.s32 1, %s1038_s14  ;;  %s47_s20 = sadd.s32 1, %s1042_s15 }
   0xd   : > { %p45_p0 = scmp.ge.s32.totalorder %s43_s19, 4  ;;  %s58_s21 = sadd.s32 1, %s1026_s11 }
   0xe   : > { %p65_p1 = scmp.ne.s32.totalorder %s1026_s11, %s1022_s10  ;;  %p66_p2 = scmp.eq.s32.totalorder %s1046_s16, 0 }
   0xf   : > { %s1362_s19 = smov (%p45_p0, %s43_s19), 0  ;;  %s1364_s20 = smov (!%p45_p0, %s47_s20), %s1042_s15 }
  0x10   : > { %1342 = sst [smem:[#allocation11_spill]] %s1362_s19  ;;  %s52_s22 = ssub.s32 %s1038_s14, %s1362_s19 }
  0x11   : > { %p1150_p3 = por %p66_p2, %p65_p1  ;;  %p49_p4 = scmp.ge.s32.totalorder %s1364_s20, 2 }
  0x12   : > { %p71_p5 = scmp.ne.s32.totalorder %s1022_s10, %s1018_s9  ;;  %p72_p6 = scmp.eq.s32.totalorder %s682_s17, 0 }
  0x13   : > { %p131_p7 = scmp.eq.s32.totalorder %s682_s17, 7  ;;  %s1366_s20 = smov (%p49_p4, %s1364_s20), 0 }
  0x14   : > { %1344 = sst [smem:[#allocation12_spill]] %s1366_s20  ;;  %p1158_p8 = por %p72_p6, %p71_p5 }
  0x15   : > { %p1162_p9 = por %p131_p7, %p65_p1  ;;  %s51_s26 = ssub.s32 %s1042_s15, %s1366_s20 }
  0x16   : > { %p137_p10 = scmp.eq.s32.totalorder %s683_s18, 7  ;;  %s53_s27 = sor.u32 %s52_s22, %s51_s26 }
  0x17   : > { %p56_p11 = scmp.eq.s32.totalorder %s53_s27, 0  ;;  %p719_p13 = scmp.lt.s32.totalorder %s1046_s16, 8 }
  0x18   : > { %p1168_p12 = por %p137_p10, %p71_p5  ;;  %s1174_s29 = sand.u32 1, %s1026_s11  }
  0x19   : > { %s1177_s30 = scalar_select %p56_p11, %s1026_s11, %s58_s21  }
  0x1a   : > { %s686_s3 = sshll.u32 %s1174_s29, 5  ;;  %s687_s4 = sshll.u32 %s1038_s14, 2 }
  0x1b   : > { %1348 = sst [smem:[#allocation13_spill]] %s1177_s30  ;;  %s688_s5 = sshll.u32 %s1042_s15, 4 }
  0x1c   : > { %s161_s6 = scalar_lea.vmem [#allocation2], %s686_s3  ;;  %s167_s8 = sadd.s32 %s688_s5, %s687_s4 }
  0x1d   : > { %s172_s7 = sshll.u32 %s161_s6, 4  ;;  %s689_s17 = sshll.u32 %s167_s8, 3  ;;  %s173_s7 = int_to_ptr.vmem [resolvable:$true] %s172_s7 }
  0x1e   : > { %p1184_p0 = pnand %p719_p13, %p1150_p3  ;;  %s1350_s0 = sld [smem:[#allocation14_spill]] }
  0x1f   : > { %s158_s20 = scalar_lea.sflag [#allocation3], %s1174_s29  ;;  %s1048_s3 = smov 128  }
  0x20   : > { %s1049_s6 = smov 8   ;;  %p693_p1 = scmp.ge.s32.totalorder %s1046_s16, 1 }
  0x21   : > { %p202_p2 = scmp.lt.s32.totalorder %s1046_s16, 9  ;;  %s690_s23 = sshll.u32 %s1174_s29, 3 }
  0x22   : > { %s691_s4 = sshll.u32 %s1042_s15, 2  ;;  %s186_s5 = scalar_lea.vmem [#allocation5], %s690_s23 }
  0x23   : > { %p203_p3 = pnand %p693_p1, %p202_p2  ;;  %s197_s8 = sshll.u32 %s186_s5, 4  ;;  %s198_s8 = int_to_ptr.vmem [resolvable:$true] %s197_s8 }
  0x24   : > { %s169_s26 = scalar_lea.hbm %s1350_s0, %s689_s17  ;;  %s191_s19 = sadd.s32 %s1038_s14, %s691_s4 }
  0x25   : > { %s170_s27 = sshll.u32 %s169_s26, 4  ;;  %s692_s21 = sshll.u32 %s191_s19, 3  ;;  %s171_s27 = int_to_ptr.hbm [resolvable:$true] %s170_s27 }
  0x26   : > { %711 = dma.hbm_to_vmem [thread:$0]  (!%p1184_p0), %s171_s27, 512, %s173_s7, %s158_s20, %s1048_s3, %s1048_s3, %s1049_s6  }
  0x27   : > { %s193_s26 = scalar_lea.hbm %s1337_s1, %s692_s21  ;;  %s183_s30 = scalar_lea.sflag [#allocation6], %s1174_s29 }
  0x28   : > { %s195_s0 = sshll.u32 %s193_s26, 4  ;;  %206 = sbr.rel (%p203_p3) target bundleno = 285 (0x11d), region = 28  ;;  %s196_s0 = int_to_ptr.hbm [resolvable:$true] %s195_s0 }
  0x29   : > { %714 = dma.hbm_to_vmem [thread:$0]  (!%p1184_p0), %s196_s0, 128, %s198_s8, %s183_s30  }
  0x2a   : > { %s1206_s20 = sand.u32 (!%p203_p3), 1, %s1022_s10  }
  0x2b   : > { %s694_s7 = sshll.u32 (!%p203_p3), %s1206_s20, 5  ;;  %s209_s27 = scalar_lea.sflag (!%p203_p3), [#allocation3], %s1206_s20 }
  0x2c   : > { %s1210_s19 = scalar_lea.vmem (!%p203_p3), [#allocation2], %s694_s7 }
  0x2d   : > { %1005 = dma.done.wait (%p1158_p8), %s209_s27, 512  }
  0x2e   : > { %1007 = vsyncadd (%p1158_p8), %s209_s27, 4294966784  ;;  %s695_s0 = sshll.u32 %s1206_s20, 3  ;;  %s219_s29 = scalar_lea.sflag [#allocation6], %s1206_s20 }
  0x2f   : > { %s222_s30 = scalar_lea.vmem [#allocation5], %s695_s0 }
  0x30   : > { %1009 = dma.done.wait (%p1158_p8), %s219_s29, 128  }
  0x31   : > { %1011 = vsyncadd (%p1158_p8), %s219_s29, 4294967168  ;;  %v1050_v0 = vmov 2   ;;  %v1051_v1 = vmov 0   ;;  %v1052_v2 = vmov 4   ;;  %v1224_v3 = vld [vmem:[%s222_s30] sm:$0xff]  ;;  %v1053_v4 = vmov 3  }
  0x32   : > { %821 = vset.pattern.permute.xlu1 %v1050_v0  ;;  %819 = vset.pattern.permute.xlu0 %v1051_v1  ;;  %v1054_v5 = vmov 1   ;;  %v1055_v6 = vmov 5   ;;  %v1056_v7 = vmov 6   ;;  %v1057_v8 = vmov 8   ;;  %v853_v37 = vld [vmem:[%s1210_s19] ss:$0 sm:$0xff] }
  0x33   : > { %823 = vset.pattern.permute.xlu2 %v1052_v2  ;;  %272 = vperm.xlu1 %821, %v1224_v3   ;;  %v1058_v9 = vmov 7   ;;  %v1059_v10 = vmov 9   ;;  %v1060_v11 = vmov 13   ;;  %v1061_v12 = vmov 10   ;;  %v856_v39 = vld [vmem:[%s1210_s19 + $0x1] ss:$0 sm:$0xff] }
  0x34   : > { %254 = vperm.xlu0 %819, %v1224_v3   ;;  %290 = vperm.xlu2 %823, %v1224_v3   ;;  %v1062_v13 = vmov 11   ;;  %v1063_v14 = vmov 18   ;;  %v1064_v15 = vmov 12   ;;  %v1065_v16 = vmov 14   ;;  %v852_v40 = vld [vmem:[%s1210_s19 + $0x2] ss:$0 sm:$0xff] }
  0x35   : > { %v1066_v17 = vmov 23   ;;  %v1067_v18 = vmov 15   ;;  %v1068_v19 = vmov 16   ;;  %v1069_v20 = vmov 17   ;;  %v855_v47 = vld [vmem:[%s1210_s19 + $0x3] ss:$0 sm:$0xff] }
  0x36   : > { %v1070_v21 = vmov 28   ;;  %v1071_v22 = vmov 19   ;;  %v1072_v23 = vmov 20   ;;  %v1073_v24 = vmov 31   ;;  %v854_v51 = vld [vmem:[%s1210_s19 + $0x4] ss:$0 sm:$0xff] }
  0x37   : > { %v1074_v25 = vmov 21   ;;  %v1075_v26 = vmov 22   ;;  %v1076_v27 = vmov 24   ;;  %v1077_v28 = vmov 25   ;;  %v857_v54 = vld [vmem:[%s1210_s19 + $0x5] ss:$0 sm:$0xff] }
  0x38   : > { %v1078_v29 = vmov 26   ;;  %v1079_v30 = vmov 27   ;;  %v1080_v31 = vmov 29   ;;  %v1081_v32 = vmov 30   ;;  %v858_v61 = vld [vmem:[%s1210_s19 + $0x6] ss:$0 sm:$0xff] }
  0x39   : > { %v859_v2 = vld [vmem:[%s1210_s19 + $0x7] ss:$0 sm:$0xff]  ;;  %s698_s24 = sshll.u32 %s1034_s13, 2  ;;  %s248_s13 = scalar_lea.vmem [#allocation7], %s695_s0 }
  0x3a   : > { %s554_s18 = sadd.s32 %s1030_s12, %s698_s24  ;;  %s558_s5 = sshll.u32 %s248_s13, 4  ;;  %s559_s5 = int_to_ptr.vmem [resolvable:$true] %s558_s5 }
  0x3b   : > { %822 = vset.pattern.permute.xlu1 %v1053_v4  ;;  %s699_s3 = sshll.u32 %s554_s18, 3  ;;  %s542_s12 = scalar_lea.sflag [#allocation4], %s1206_s20 }
  0x3c   : > { %820 = vset.pattern.permute.xlu0 %v1054_v5  ;;  %281 = vperm.xlu1 %822, %v1224_v3   ;;  %s556_s4 = scalar_lea.hbm %s1338_s2, %s699_s3  ;;  %s964_s7 = scalar_lea.hbm %s1338_s2, 64 }
  0x3d   : > { %263 = vperm.xlu0 %820, %v1224_v3   ;;  %824 = vset.pattern.permute.xlu2 %v1055_v6  ;;  %s560_s8 = sshll.u32 %s556_s4, 4  ;;  %s561_s8 = int_to_ptr.hbm [resolvable:$true] %s560_s8 }
  0x3e   : > { %299 = vperm.xlu2 %824, %v1224_v3   ;;  %s958_s21 = sshra.s32 %s561_s8, 4  ;;  %s959_s21 = int_to_ptr.hbm [resolvable:$true] %s958_s21 }
  0x3f   : > { %s960_s22 = scalar_lea.hbm %s959_s21, 8  ;;  %p965_p7 = scmp.lt.s32.totalorder %s959_s21, %s1338_s2 }
  0x40   : > { %p961_p4 = scmp.ne.s32.totalorder %s959_s21, %s960_s22  ;;  %p966_p8 = scmp.lt.s32.totalorder %s964_s7, %s960_s22 }
  0x42   : > { %p962_p5 = pnand %p961_p4, %p1162_p9  ;;  %p967_p10 = por %p966_p8, %p965_p7 }
  0x44   : > { %825 = vset.pattern.permute.xlu1 %v1056_v7  ;;  %v860_v7 = vld [vmem:[%s1210_s19 + $0x8] ss:$0 sm:$0xff]  ;;  %p963_p6 = pneg %p962_p5 }
  0x45   : > { %827 = vset.pattern.permute.xlu0 %v1057_v8  ;;  %308 = vperm.xlu1 %825, %v1224_v3  }
  0x46   : > { %326 = vperm.xlu0 %827, %v1224_v3   ;;  %826 = vset.pattern.permute.xlu2 %v1058_v9  ;;  %p968_p11 = pnand %p967_p10, %p963_p6 }
  0x47   : > { %317 = vperm.xlu2 %826, %v1224_v3  }
  0x4d   : > { %828 = vset.pattern.permute.xlu1 %v1059_v10  ;;  %v861_v10 = vld [vmem:[%s1210_s19 + $0x9] ss:$0 sm:$0xff] }
  0x4e   : > { %832 = vset.pattern.permute.xlu0 %v1060_v11  ;;  %335 = vperm.xlu1 %828, %v1224_v3  }
  0x4f   : > { %371 = vperm.xlu0 %832, %v1224_v3   ;;  %829 = vset.pattern.permute.xlu2 %v1061_v12 }
  0x50   : > { %344 = vperm.xlu2 %829, %v1224_v3  }
  0x56   : > { %830 = vset.pattern.permute.xlu1 %v1062_v13 }
  0x57   : > { %837 = vset.pattern.permute.xlu0 %v1063_v14  ;;  %353 = vperm.xlu1 %830, %v1224_v3  }
  0x58   : > { %416 = vperm.xlu0 %837, %v1224_v3   ;;  %831 = vset.pattern.permute.xlu2 %v1064_v15  ;;  %v862_v15 = vld [vmem:[%s1210_s19 + $0xa] ss:$0 sm:$0xff] }
  0x59   : > { %362 = vperm.xlu2 %831, %v1224_v3  }
  0x5f   : > { %833 = vset.pattern.permute.xlu1 %v1065_v16 }
  0x60   : > { %842 = vset.pattern.permute.xlu0 %v1066_v17  ;;  %380 = vperm.xlu1 %833, %v1224_v3  }
  0x61   : > { %461 = vperm.xlu0 %842, %v1224_v3   ;;  %834 = vset.pattern.permute.xlu2 %v1067_v18 }
  0x62   : > { %389 = vperm.xlu2 %834, %v1224_v3  }
  0x68   : > { %835 = vset.pattern.permute.xlu1 %v1068_v19  ;;  %v863_v19 = vld [vmem:[%s1210_s19 + $0xb] ss:$0 sm:$0xff] }
  0x69   : > { %398 = vperm.xlu1 %835, %v1224_v3   ;;  %847 = vset.pattern.permute.xlu0 %v1070_v21 }
  0x6a   : > { %836 = vset.pattern.permute.xlu2 %v1069_v20  ;;  %506 = vperm.xlu0 %847, %v1224_v3  }
  0x6b   : > { %407 = vperm.xlu2 %836, %v1224_v3  }
  0x71   : > { %838 = vset.pattern.permute.xlu1 %v1071_v22 }
  0x72   : > { %425 = vperm.xlu1 %838, %v1224_v3   ;;  %851 = vset.pattern.permute.xlu0 %v1073_v24 }
  0x73   : > { %839 = vset.pattern.permute.xlu2 %v1072_v23 }
  0x74   : > { %434 = vperm.xlu2 %839, %v1224_v3  }
  0x7a   : > { %840 = vset.pattern.permute.xlu1 %v1074_v25  ;;  %v864_v25 = vld [vmem:[%s1210_s19 + $0xc] ss:$0 sm:$0xff] }
  0x7b   : > { %443 = vperm.xlu1 %840, %v1224_v3  }
  0x7c   : > { %841 = vset.pattern.permute.xlu2 %v1075_v26 }
  0x7d   : > { %452 = vperm.xlu2 %841, %v1224_v3  }
  0x83   : > { %843 = vset.pattern.permute.xlu1 %v1076_v27 }
  0x84   : > { %470 = vperm.xlu1 %843, %v1224_v3  }
  0x85   : > { %844 = vset.pattern.permute.xlu2 %v1077_v28 }
  0x86   : > { %479 = vperm.xlu2 %844, %v1224_v3  }
  0x8c   : > { %845 = vset.pattern.permute.xlu1 %v1078_v29 }
  0x8d   : > { %488 = vperm.xlu1 %845, %v1224_v3  }
  0x8e   : > { %846 = vset.pattern.permute.xlu2 %v1079_v30  ;;  %v291_v33 = vpop.permute.xlu2 %290  ;;  %v865_v30 = vld [vmem:[%s1210_s19 + $0xd] ss:$0 sm:$0xff] }
  0x8f   : > { %497 = vperm.xlu2 %846, %v1224_v3   ;;  %v293_v56 = vsub.f32 %v854_v51, %v291_v33 }
  0x91   : > { %v294_v62 = vand.u32 2147483647, %v293_v56 }
  0x95   : > { %848 = vset.pattern.permute.xlu1 %v1080_v31 }
  0x96   : > { %515 = vperm.xlu1 %848, %v1224_v3  }
  0x97   : > { %849 = vset.pattern.permute.xlu2 %v1081_v32 }
  0x98   : > { %524 = vperm.xlu2 %849, %v1224_v3   ;;  %v300_v34 = vpop.permute.xlu2 %299 }
  0x99   : > { %v302_v60 = vsub.f32 %v857_v54, %v300_v34  ;;  %v866_v34 = vld [vmem:[%s1210_s19 + $0xe] ss:$0 sm:$0xff] }
  0x9b   : > { %v303_v0 = vand.u32 2147483647, %v302_v60 }
  0x9e   : > { %850 = vset.pattern.permute.xlu1 %v1073_v24 }
  0x9f   : > { %533 = vperm.xlu1 %850, %v1224_v3  }
  0xa1   : > { %v318_v45 = vpop.permute.xlu2 %317 }
  0xa2   : > { %v320_v6 = vsub.f32 %v859_v2, %v318_v45 }
  0xa4   : > { %v321_v12 = vand.u32 2147483647, %v320_v6 }
  0xa5   : > { %v273_v35 = vpop.permute.xlu1 %272 }
  0xa6   : > { %v255_v36 = vpop.permute.xlu0 %254  ;;  %v275_v46 = vsub.f32 %v852_v40, %v273_v35  ;;  %v867_v40 = vld [vmem:[%s1210_s19 + $0xf] ss:$0 sm:$0xff] }
  0xa7   : > { %v257_v38 = vsub.f32 %v853_v37, %v255_v36 }
  0xa8   : > { %v276_v50 = vand.u32 2147483647, %v275_v46 }
  0xa9   : > { %v258_v43 = vand.u32 2147483647, %v257_v38 }
  0xaa   : > { %v345_v58 = vpop.permute.xlu2 %344 }
  0xab   : > { %v347_v21 = vsub.f32 %v862_v15, %v345_v58  ;;  %v871_v58 = vld [vmem:[%s1210_s19 + $0x13] ss:$0 sm:$0xff]  ;;  %v875_v15 = vld [vmem:[%s1210_s19 + $0x17] ss:$0 sm:$0xff] }
  0xad   : > { %v348_v27 = vand.u32 2147483647, %v347_v21 }
  0xae   : > { %v282_v41 = vpop.permute.xlu1 %281 }
  0xaf   : > { %v264_v42 = vpop.permute.xlu0 %263  ;;  %v284_v52 = vsub.f32 %v855_v47, %v282_v41 }
  0xb0   : > { %v266_v44 = vsub.f32 %v856_v39, %v264_v42 }
  0xb1   : > { %v285_v57 = vand.u32 2147483647, %v284_v52 }
  0xb2   : > { %v267_v48 = vand.u32 2147483647, %v266_v44 }
  0xb3   : > { %v363_v9 = vpop.permute.xlu2 %362 }
  0xb4   : > { %v268_v49 = vadd.f32 %v267_v48, %v258_v43  ;;  %v365_v29 = vsub.f32 %v864_v25, %v363_v9  ;;  %v868_v43 = vld [vmem:[%s1210_s19 + $0x10] ss:$0 sm:$0xff]  ;;  %v877_v25 = vld [vmem:[%s1210_s19 + $0x19] ss:$0 sm:$0xff] }
  0xb6   : > { %v277_v53 = vadd.f32 %v276_v50, %v268_v49  ;;  %v366_v36 = vand.u32 2147483647, %v365_v29  ;;  %v869_v49 = vld [vmem:[%s1210_s19 + $0x11] ss:$0 sm:$0xff] }
  0xb7   : > { %v309_v55 = vpop.permute.xlu1 %308 }
  0xb8   : > { %v286_v59 = vadd.f32 %v285_v57, %v277_v53  ;;  %v311_v1 = vsub.f32 %v858_v61, %v309_v55  ;;  %v327_v8 = vpop.permute.xlu0 %326  ;;  %v870_v55 = vld [vmem:[%s1210_s19 + $0x12] ss:$0 sm:$0xff] }
  0xb9   : > { %v329_v13 = vsub.f32 %v860_v7, %v327_v8 }
  0xba   : > { %v295_v63 = vadd.f32 %v294_v62, %v286_v59  ;;  %v312_v5 = vand.u32 2147483647, %v311_v1 }
  0xbb   : > { %v330_v18 = vand.u32 2147483647, %v329_v13 }
  0xbc   : > { %v304_v4 = vadd.f32 %v303_v0, %v295_v63  ;;  %v390_v22 = vpop.permute.xlu2 %389  ;;  %v872_v0 = vld [vmem:[%s1210_s19 + $0x14] ss:$0 sm:$0xff] }
  0xbd   : > { %v392_v46 = vsub.f32 %v867_v40, %v390_v22  ;;  %v880_v40 = vld [vmem:[%s1210_s19 + $0x1c] ss:$0 sm:$0xff] }
  0xbe   : > { %v313_v11 = vadd.f32 %v312_v5, %v304_v4 }
  0xbf   : > { %v393_v51 = vand.u32 2147483647, %v392_v46 }
  0xc0   : > { %v336_v3 = vpop.permute.xlu1 %335  ;;  %v322_v17 = vadd.f32 %v321_v12, %v313_v11 }
  0xc1   : > { %v338_v14 = vsub.f32 %v861_v10, %v336_v3  ;;  %v372_v32 = vpop.permute.xlu0 %371  ;;  %v873_v3 = vld [vmem:[%s1210_s19 + $0x15] ss:$0 sm:$0xff]  ;;  %v874_v10 = vld [vmem:[%s1210_s19 + $0x16] ss:$0 sm:$0xff] }
  0xc2   : > { %v331_v23 = vadd.f32 %v330_v18, %v322_v17  ;;  %v374_v37 = vsub.f32 %v865_v30, %v372_v32  ;;  %v876_v18 = vld [vmem:[%s1210_s19 + $0x18] ss:$0 sm:$0xff]  ;;  %v878_v30 = vld [vmem:[%s1210_s19 + $0x1a] ss:$0 sm:$0xff]  ;;  %v879_v32 = vld [vmem:[%s1210_s19 + $0x1b] ss:$0 sm:$0xff] }
  0xc3   : > { %v339_v20 = vand.u32 2147483647, %v338_v14 }
  0xc4   : > { %v375_v42 = vand.u32 2147483647, %v374_v37 }
  0xc5   : > { %v340_v26 = vadd.f32 %v339_v20, %v331_v23  ;;  %v408_v38 = vpop.permute.xlu2 %407 }
  0xc6   : > { %v410_v54 = vsub.f32 %v869_v49, %v408_v38 }
  0xc7   : > { %v349_v33 = vadd.f32 %v348_v27, %v340_v26 }
  0xc8   : > { %v411_v61 = vand.u32 2147483647, %v410_v54 }
  0xc9   : > { %v354_v16 = vpop.permute.xlu1 %353 }
  0xca   : > { %v356_v24 = vsub.f32 %v863_v19, %v354_v16  ;;  %v417_v56 = vpop.permute.xlu0 %416 }
  0xcb   : > { %v419_v62 = vsub.f32 %v870_v55, %v417_v56  ;;  %v883_v56 = vld [vmem:[%s1210_s19 + $0x1f] ss:$0 sm:$0xff] }
  0xcc   : > { %v357_v28 = vand.u32 2147483647, %v356_v24 }
  0xcd   : > { %v420_v2 = vand.u32 2147483647, %v419_v62 }
  0xce   : > { %v358_v35 = vadd.f32 %v357_v28, %v349_v33  ;;  %v435_v52 = vpop.permute.xlu2 %434 }
  0xcf   : > { %v437_v6 = vsub.f32 %v872_v0, %v435_v52 }
  0xd0   : > { %v367_v41 = vadd.f32 %v366_v36, %v358_v35 }
  0xd1   : > { %v438_v12 = vand.u32 2147483647, %v437_v6 }
  0xd2   : > { %v381_v31 = vpop.permute.xlu1 %380  ;;  %v376_v47 = vadd.f32 %v375_v42, %v367_v41 }
  0xd3   : > { %v383_v39 = vsub.f32 %v866_v34, %v381_v31  ;;  %v462_v16 = vpop.permute.xlu0 %461 }
  0xd4   : > { %v464_v22 = vsub.f32 %v875_v15, %v462_v16 }
  0xd5   : > { %v384_v45 = vand.u32 2147483647, %v383_v39 }
  0xd6   : > { %v465_v27 = vand.u32 2147483647, %v464_v22 }
  0xd7   : > { %v385_v50 = vadd.f32 %v384_v45, %v376_v47  ;;  %v453_v4 = vpop.permute.xlu2 %452 }
  0xd8   : > { %v455_v14 = vsub.f32 %v874_v10, %v453_v4 }
  0xd9   : > { %v394_v57 = vadd.f32 %v393_v51, %v385_v50 }
  0xda   : > { %v456_v21 = vand.u32 2147483647, %v455_v14 }
  0xdb   : > { %v399_v44 = vpop.permute.xlu1 %398 }
  0xdc   : > { %v401_v48 = vsub.f32 %v868_v43, %v399_v44  ;;  %v507_v41 = vpop.permute.xlu0 %506  ;;  %v881_v43 = vld [vmem:[%s1210_s19 + $0x1d] ss:$0 sm:$0xff] }
  0xdd   : > { %v509_v46 = vsub.f32 %v880_v40, %v507_v41 }
  0xde   : > { %v402_v53 = vand.u32 2147483647, %v401_v48  ;;  %v882_v48 = vld [vmem:[%s1210_s19 + $0x1e] ss:$0 sm:$0xff] }
  0xdf   : > { %v510_v52 = vand.u32 2147483647, %v509_v46 }
  0xe0   : > { %v403_v60 = vadd.f32 %v402_v53, %v394_v57  ;;  %v480_v19 = vpop.permute.xlu2 %479 }
  0xe1   : > { %v482_v29 = vsub.f32 %v877_v25, %v480_v19 }
  0xe2   : > { %v412_v1 = vadd.f32 %v411_v61, %v403_v60 }
  0xe3   : > { %v483_v36 = vand.u32 2147483647, %v482_v29 }
  0xe4   : > { %v426_v59 = vpop.permute.xlu1 %425  ;;  %v421_v8 = vadd.f32 %v420_v2, %v412_v1 }
  0xe5   : > { %v428_v63 = vsub.f32 %v871_v58, %v426_v59 }
  0xe7   : > { %v429_v5 = vand.u32 2147483647, %v428_v63 }
  0xe9   : > { %v430_v11 = vadd.f32 %v429_v5, %v421_v8  ;;  %v498_v34 = vpop.permute.xlu2 %497 }
  0xea   : > { %v500_v39 = vsub.f32 %v879_v32, %v498_v34 }
  0xeb   : > { %v439_v17 = vadd.f32 %v438_v12, %v430_v11 }
  0xec   : > { %v501_v45 = vand.u32 2147483647, %v500_v39 }
  0xed   : > { %v444_v7 = vpop.permute.xlu1 %443 }
  0xee   : > { %v446_v9 = vsub.f32 %v873_v3, %v444_v7 }
  0xf0   : > { %v447_v13 = vand.u32 2147483647, %v446_v9 }
  0xf2   : > { %v448_v20 = vadd.f32 %v447_v13, %v439_v17  ;;  %v525_v50 = vpop.permute.xlu2 %524 }
  0xf3   : > { %v527_v54 = vsub.f32 %v882_v48, %v525_v50 }
  0xf4   : > { %v457_v26 = vadd.f32 %v456_v21, %v448_v20 }
  0xf5   : > { %v528_v58 = vand.u32 2147483647, %v527_v54 }
  0xf6   : > { %v471_v23 = vpop.permute.xlu1 %470  ;;  %v466_v31 = vadd.f32 %v465_v27, %v457_v26 }
  0xf7   : > { %v473_v24 = vsub.f32 %v876_v18, %v471_v23 }
  0xf9   : > { %v474_v28 = vand.u32 2147483647, %v473_v24 }
  0xfb   : > { %v475_v35 = vadd.f32 %v474_v28, %v466_v31 }
  0xfd   : > { %v484_v42 = vadd.f32 %v483_v36, %v475_v35 }
  0xff   : > { %v489_v33 = vpop.permute.xlu1 %488 }
 0x100   : > { %v491_v37 = vsub.f32 %v878_v30, %v489_v33 }
 0x102   : > { %v492_v38 = vand.u32 2147483647, %v491_v37 }
 0x104   : > { %v493_v44 = vadd.f32 %v492_v38, %v484_v42 }
 0x106   : > { %v502_v51 = vadd.f32 %v501_v45, %v493_v44 }
 0x108   : > { %v516_v47 = vpop.permute.xlu1 %515  ;;  %v511_v55 = vadd.f32 %v510_v52, %v502_v51 }
 0x109   : > { %v518_v49 = vsub.f32 %v881_v43, %v516_v47 }
 0x10b   : > { %v519_v53 = vand.u32 2147483647, %v518_v49 }
 0x10d   : > { %v520_v57 = vadd.f32 %v519_v53, %v511_v55 }
 0x10f   : > { %v529_v61 = vadd.f32 %v528_v58, %v520_v57 }
 0x111   : > { %v534_v59 = vpop.permute.xlu1 %533 }
 0x112   : > { %v536_v60 = vsub.f32 %v883_v56, %v534_v59 }
 0x114   : > { %v537_v62 = vand.u32 2147483647, %v536_v60 }
 0x116   : > { %v538_v63 = vadd.f32 %v537_v62, %v529_v61 }
 0x118   : > { %v539_v0 = vmul.f32 -0.17677669, %v538_v63 }
 0x11a   : > { %540 = vst [vmem:[%s248_s13] sm:$0xff] %v539_v0 }
 0x11b   : > { %971 = shalt.err (!%p968_p11)
}
 0x11c   : > { %706 = dma.vmem_to_hbm [thread:$0]  (%p1162_p9), %s559_s5, 128, %s561_s8, %s542_s12  }
 0x11d PF: > { %p720_p13 = scmp.ge.s32.totalorder %s1046_s16, 2  ;;  %s572_s20 = sand.u32 1, %s1018_s9  }
 0x11e   : > { %s573_s0 = scalar_lea.sflag [#allocation4], %s572_s20 }
 0x11f   : > { %p716_p0 = pnand %p720_p13, %p1168_p12 }
 0x121   : > { %p717_p1 = pneg %p716_p0 }
 0x123   : > { %1013 = dma.done.wait (%p717_p1), %s573_s0, 128  }
 0x124   : > { %1015 = vsyncadd (%p717_p1), %s573_s0, 4294967168  ;;  %s21_s16 = sadd.s32 1, %s1046_s16   ;;  %s1351_s29 = sld [smem:[#allocation13_spill]] }
 0x125   : > { %p18_p2 = scmp.ge.s32.totalorder %s21_s16, 10   ;;  %s1352_s25 = sld [smem:[#allocation11_spill]] }
 0x126   : > { %s1353_s30 = sld [smem:[#allocation12_spill]]  ;;  %s1354_s9 = smov %s1022_s10 }
 0x127   : > { %s1355_s10 = smov %s1026_s11  ;;  %s1357_s12 = smov %s1038_s14 }
 0x128   : > { %s1358_s13 = smov %s1042_s15  ;;  %20 = sbr.rel (!%p18_p2) target bundleno = 11 (0xb), region = 86 }
 0x12a   : > { %s1356_s11 = smov %s1351_s29 }
 0x12b   : > { %s1359_s14 = smov %s1352_s25 }
 0x12c   : > { %s1360_s15 = smov %s1353_s30 }
 0x12d   :  { %579 = vsyncpa [#allocation3], 1 }
 0x12e   :  { %581 = vsyncpa [#allocation3 + $0x1], 1 }
 0x12f   :  { %582 = vsyncpa [#allocation6], 1 }
 0x130   :  { %584 = vsyncpa [#allocation6 + $0x1], 1 }
 0x131   :  { %585 = vsyncpa [#allocation4], 1 }
 0x132   :  { %587 = vsyncpa [#allocation4 + $0x1], 1 }

</bundles_post_ra>
